<compile_context>
chip_gen: v7x
topology: tpu7x:2x2x1
jax: 0.10.0
libtpu: 0.0.40
codegen_flags: <defaults>
</compile_context>

<pallas_src>
import functools

import jax
import jax.numpy as jnp
from jax.experimental import pallas as pl
from jax.experimental.pallas import tpu as pltpu


# ----------------------------------------------------------------------------
# Pallas kernel (transposed layout: activations are (features, TILE_B))
# ----------------------------------------------------------------------------
def _neumf_kernel(sigmoid, n_layers, *refs):
    # refs layout:
    #   xmfu, xmfi, xmlpu, xmlpi,
    #   w0u, w0i, b0,
    #   (w_i, b_i) * (n_layers - 1),
    #   wf_mf, wf_mlp, bf(SMEM),
    #   out
    (xmfu_ref, xmfi_ref, xmlpu_ref, xmlpi_ref,
     w0u_ref, w0i_ref, b0_ref) = refs[:7]
    rest = refs[7:]
    n_hidden = n_layers - 1
    layer_refs = rest[:2 * n_hidden]
    wf_mf_ref, wf_mlp_ref, bf_ref, out_ref = rest[2 * n_hidden:]

    f32 = jnp.float32

    # --- MF branch: elementwise product, batch on the lane axis (VPU, f32) ---
    xmf = xmfu_ref[...] * xmfi_ref[...]                       # (mf_dim, TB)

    # --- MLP branch. First layer consumes the two embedding halves separately,
    # replacing concat([xmlpu, xmlpi]) with a column-split of W0. -------------
    x = (jnp.dot(w0u_ref[...], xmlpu_ref[...], preferred_element_type=f32)
         + jnp.dot(w0i_ref[...], xmlpi_ref[...], preferred_element_type=f32)
         + b0_ref[...])
    x = jnp.maximum(x, 0.0)                                    # (d1, TB) f32

    for i in range(n_hidden):
        w_ref = layer_refs[2 * i]
        b = layer_refs[2 * i + 1][...]                          # (d_out, 1) f32
        x = jnp.dot(w_ref[...], x.astype(w_ref.dtype),
                    preferred_element_type=f32) + b
        x = jnp.maximum(x, 0.0)

    # --- Final Linear (out_features == 1): VPU multiply + cross-sublane reduce
    # instead of two N=1 MXU matmuls. -----------------------------------------
    out = (jnp.sum(wf_mf_ref[...] * xmf, axis=0, keepdims=True)
           + jnp.sum(wf_mlp_ref[...] * x, axis=0, keepdims=True)
           + bf_ref[0, 0])                                      # (1, TB)
    if sigmoid:
        out = jax.nn.sigmoid(out)
    out_ref[...] = out.astype(out_ref.dtype)


# ----------------------------------------------------------------------------
# Wrapper
# ----------------------------------------------------------------------------
def neumf_forward(params, user, item, sigmoid=False, tile_b=512,
                  matmul_dtype=jnp.float32):
    """NeuMF forward; hot path is one batch-tiled Pallas call."""
    assert tile_b % 128 == 0
    batch = user.shape[0]

    # Tile / pad the batch to a lane-friendly multiple.
    tile_b = min(tile_b, 128 * pl.cdiv(batch, 128))
    padded_b = tile_b * pl.cdiv(batch, tile_b)
    pad = padded_b - batch
    user_p = jnp.pad(user, (0, pad)) if pad else user   # index 0 is a valid row
    item_p = jnp.pad(item, (0, pad)) if pad else item

    # --- glue: embedding gathers, then transpose to (features, batch) --------
    xmfu_t = params["mf_user_embed"][user_p].T                      # (mf_dim, PB) f32
    xmfi_t = params["mf_item_embed"][item_p].T                      # (mf_dim, PB) f32
    xmlpu_t = params["mlp_user_embed"][user_p].T.astype(matmul_dtype)  # (d0/2, PB)
    xmlpi_t = params["mlp_item_embed"][item_p].T.astype(matmul_dtype)  # (d0/2, PB)

    mlp_ws = [w.astype(matmul_dtype) for w in params["mlp_weights"]]  # (out, in)
    mlp_bs = [b.astype(jnp.float32) for b in params["mlp_biases"]]    # (out, 1)
    n_layers = len(mlp_ws)
    d_half = params["mlp_user_embed"].shape[1]
    w0u = mlp_ws[0][:, :d_half]
    w0i = mlp_ws[0][:, d_half:]

    wf_mf = params["final_w_mf"].astype(jnp.float32)    # (mf_dim, 1)
    wf_mlp = params["final_w_mlp"].astype(jnp.float32)  # (d_last, 1)
    bf = params["final_b"].astype(jnp.float32)          # (1, 1) -> SMEM

    inputs = [xmfu_t, xmfi_t, xmlpu_t, xmlpi_t, w0u, w0i, mlp_bs[0]]
    for w, b in zip(mlp_ws[1:], mlp_bs[1:]):
        inputs += [w, b]
    inputs += [wf_mf, wf_mlp, bf]

    # --- BlockSpecs -----------------------------------------------------------
    def batch_spec(arr):               # batch-tiled activations
        return pl.BlockSpec((arr.shape[0], tile_b), lambda i: (0, i))

    def resident_spec(arr):            # weights/biases resident across the grid
        return pl.BlockSpec(arr.shape, lambda i: (0, 0))

    in_specs = [batch_spec(xmfu_t), batch_spec(xmfi_t),
                batch_spec(xmlpu_t), batch_spec(xmlpi_t),
                resident_spec(w0u), resident_spec(w0i), resident_spec(mlp_bs[0])]
    for w, b in zip(mlp_ws[1:], mlp_bs[1:]):
        in_specs += [resident_spec(w), resident_spec(b)]
    in_specs += [resident_spec(wf_mf), resident_spec(wf_mlp),
                 pl.BlockSpec(memory_space=pltpu.MemorySpace.SMEM)]

    out_spec = pl.BlockSpec((1, tile_b), lambda i: (0, i))   # lane-dense output

    kernel = functools.partial(_neumf_kernel, sigmoid, n_layers)
    out_t = pl.pallas_call(
        kernel,
        out_shape=jax.ShapeDtypeStruct((1, padded_b), jnp.float32),
        grid_spec=pltpu.PrefetchScalarGridSpec(
            num_scalar_prefetch=0,
            grid=(padded_b // tile_b,),
            in_specs=in_specs,
            out_specs=out_spec,
        ),
        compiler_params=pltpu.CompilerParams(
            dimension_semantics=("parallel",),   # megacore batch split on v7x
        ),
    )(*inputs)

    # (1, PB) row-major == batch order -> free reshape, then drop padding.
    return out_t.reshape(padded_b, 1)[:batch]


# ----------------------------------------------------------------------------
# Deterministic parameter initialization (mirrors NeuMF.__init__)
# ----------------------------------------------------------------------------
def init_neumf_params(key, nb_users, nb_items, mf_dim, mlp_layer_sizes):
    assert mlp_layer_sizes[0] % 2 == 0
    n_keys = 4 + 2 * (len(mlp_layer_sizes) - 1) + 2
    keys = jax.random.split(key, n_keys)
    ki = iter(keys)

    def normal(k, shape):
        return jax.random.normal(k, shape, dtype=jnp.float32) * 0.01

    params = {
        "mf_user_embed": normal(next(ki), (nb_users, mf_dim)),
        "mf_item_embed": normal(next(ki), (nb_items, mf_dim)),
        "mlp_user_embed": normal(next(ki), (nb_users, mlp_layer_sizes[0] // 2)),
        "mlp_item_embed": normal(next(ki), (nb_items, mlp_layer_sizes[0] // 2)),
    }

    # MLP linear layers: glorot-uniform weights (PyTorch layout (out, in)),
    # default-torch-uniform biases stored as (out, 1) columns.
    mlp_weights, mlp_biases = [], []
    for i in range(1, len(mlp_layer_sizes)):
        fan_in, fan_out = mlp_layer_sizes[i - 1], mlp_layer_sizes[i]
        limit_w = (6.0 / (fan_in + fan_out)) ** 0.5
        limit_b = (1.0 / fan_in) ** 0.5
        w = jax.random.uniform(next(ki), (fan_out, fan_in), jnp.float32,
                               minval=-limit_w, maxval=limit_w)
        b = jax.random.uniform(next(ki), (fan_out, 1), jnp.float32,
                               minval=-limit_b, maxval=limit_b)
        mlp_weights.append(w)
        mlp_biases.append(b)
    params["mlp_weights"] = mlp_weights
    params["mlp_biases"] = mlp_biases

    # Final layer: lecun-uniform weights, default-torch-uniform bias.
    fan_in = mf_dim + mlp_layer_sizes[-1]
    limit_w = (3.0 / fan_in) ** 0.5
    limit_b = (1.0 / fan_in) ** 0.5
    wf = jax.random.uniform(next(ki), (fan_in, 1), jnp.float32,
                            minval=-limit_w, maxval=limit_w)   # column form
    bf = jax.random.uniform(next(ki), (1, 1), jnp.float32,
                            minval=-limit_b, maxval=limit_b)
    params["final_w_mf"] = wf[:mf_dim]
    params["final_w_mlp"] = wf[mf_dim:]
    params["final_b"] = bf
    return params


# ----------------------------------------------------------------------------
# Pure-JAX reference for sanity checking
# ----------------------------------------------------------------------------
def neumf_reference(params, user, item, sigmoid=False):
    xmf = params["mf_user_embed"][user] * params["mf_item_embed"][item]
    xmlp = jnp.concatenate(
        [params["mlp_user_embed"][user], params["mlp_item_embed"][item]], axis=1)
    for w, b in zip(params["mlp_weights"], params["mlp_biases"]):
        xmlp = jnp.maximum(xmlp @ w.T + b.T, 0.0)
    x = jnp.concatenate([xmf, xmlp], axis=1)
    wf = jnp.concatenate([params["final_w_mf"], params["final_w_mlp"]], axis=0)
    out = x @ wf + params["final_b"][0, 0]
    if sigmoid:
        out = jax.nn.sigmoid(out)
    return out


if __name__ == "__main__":
    nb_users, nb_items = 32, 48
    mf_dim = 8
    mlp_layer_sizes = [16, 32, 16, 8]
    batch = 8

    key = jax.random.PRNGKey(0)
    pkey, ukey, ikey = jax.random.split(key, 3)
    params = init_neumf_params(pkey, nb_users, nb_items, mf_dim, mlp_layer_sizes)

    user = jax.random.randint(ukey, (batch,), 0, nb_users, dtype=jnp.int32)
    item = jax.random.randint(ikey, (batch,), 0, nb_items, dtype=jnp.int32)

    # f32 path: tight check against the pure-JAX reference.
    fwd_f32 = jax.jit(functools.partial(neumf_forward, sigmoid=False))
    out = jax.block_until_ready(fwd_f32(params, user, item))
    ref = neumf_reference(params, user, item, sigmoid=False)
    assert out.shape == (batch, 1)
    assert jnp.allclose(out, ref, atol=1e-5, rtol=1e-5), (out, ref)

    # bf16-MXU path + sigmoid: looser tolerance (bf16 matmul operands, f32 acc).
    fwd_bf16 = jax.jit(functools.partial(neumf_forward, sigmoid=True,
                                         matmul_dtype=jnp.bfloat16))
    out_sig = jax.block_until_ready(fwd_bf16(params, user, item))
    ref_sig = neumf_reference(params, user, item, sigmoid=True)
    assert out_sig.shape == (batch, 1)
    assert jnp.allclose(out_sig, ref_sig, atol=2e-2, rtol=2e-2), (out_sig, ref_sig)

    print("KERNEL_OK")
</pallas_src>

<mosaic_0001>
module attributes {stable_mosaic.version = 11 : i64} {
  func.func @_neumf_kernel(%arg0: i32, %arg1: memref<8x128xf32, #tpu.memory_space<vmem>>, %arg2: memref<8x128xf32, #tpu.memory_space<vmem>>, %arg3: memref<8x128xf32, #tpu.memory_space<vmem>>, %arg4: memref<8x128xf32, #tpu.memory_space<vmem>>, %arg5: memref<32x8xf32, #tpu.memory_space<vmem>>, %arg6: memref<32x8xf32, #tpu.memory_space<vmem>>, %arg7: memref<32x1xf32, #tpu.memory_space<vmem>>, %arg8: memref<16x32xf32, #tpu.memory_space<vmem>>, %arg9: memref<16x1xf32, #tpu.memory_space<vmem>>, %arg10: memref<8x16xf32, #tpu.memory_space<vmem>>, %arg11: memref<8x1xf32, #tpu.memory_space<vmem>>, %arg12: memref<8x1xf32, #tpu.memory_space<vmem>>, %arg13: memref<8x1xf32, #tpu.memory_space<vmem>>, %arg14: memref<1x1xf32, #tpu.memory_space<smem>>, %arg15: memref<1x128xf32, #tpu.memory_space<vmem>>) attributes {dimension_semantics = [#tpu.dimension_semantics<parallel>], iteration_bounds = array<i64: 1>, scalar_prefetch = 0 : i64, scratch_operands = 0 : i64, tpu.core_type = #tpu.core_type<tc>, window_params = [{transform_indices = @transform_0, window_bounds = array<i64: 8, 128>}, {transform_indices = @transform_1, window_bounds = array<i64: 8, 128>}, {transform_indices = @transform_2, window_bounds = array<i64: 8, 128>}, {transform_indices = @transform_3, window_bounds = array<i64: 8, 128>}, {pipeline_mode = #tpu.pipeline_mode<synchronous>, transform_indices = @transform_4, window_bounds = array<i64: 32, 8>}, {pipeline_mode = #tpu.pipeline_mode<synchronous>, transform_indices = @transform_5, window_bounds = array<i64: 32, 8>}, {pipeline_mode = #tpu.pipeline_mode<synchronous>, transform_indices = @transform_6, window_bounds = array<i64: 32, 1>}, {pipeline_mode = #tpu.pipeline_mode<synchronous>, transform_indices = @transform_7, window_bounds = array<i64: 16, 32>}, {pipeline_mode = #tpu.pipeline_mode<synchronous>, transform_indices = @transform_8, window_bounds = array<i64: 16, 1>}, {pipeline_mode = #tpu.pipeline_mode<synchronous>, transform_indices = @transform_9, window_bounds = array<i64: 8, 16>}, {pipeline_mode = #tpu.pipeline_mode<synchronous>, transform_indices = @transform_10, window_bounds = array<i64: 8, 1>}, {pipeline_mode = #tpu.pipeline_mode<synchronous>, transform_indices = @transform_11, window_bounds = array<i64: 8, 1>}, {pipeline_mode = #tpu.pipeline_mode<synchronous>, transform_indices = @transform_12, window_bounds = array<i64: 8, 1>}, {transform_indices = @transform_13, window_bounds = array<i64: 1, 1>}, {transform_indices = @transform_14, window_bounds = array<i64: 1, 128>}]} {
    %c0 = arith.constant 0 : index
    %c0_0 = arith.constant 0 : index
    %0 = vector.load %arg1[%c0, %c0_0] : memref<8x128xf32, #tpu.memory_space<vmem>>, vector<8x128xf32>
    %c0_1 = arith.constant 0 : index
    %c0_2 = arith.constant 0 : index
    %1 = vector.load %arg2[%c0_1, %c0_2] : memref<8x128xf32, #tpu.memory_space<vmem>>, vector<8x128xf32>
    %2 = arith.mulf %0, %1 : vector<8x128xf32>
    %c0_3 = arith.constant 0 : index
    %c0_4 = arith.constant 0 : index
    %3 = vector.load %arg5[%c0_3, %c0_4] : memref<32x8xf32, #tpu.memory_space<vmem>>, vector<32x8xf32>
    %c0_5 = arith.constant 0 : index
    %c0_6 = arith.constant 0 : index
    %4 = vector.load %arg3[%c0_5, %c0_6] : memref<8x128xf32, #tpu.memory_space<vmem>>, vector<8x128xf32>
    %cst = arith.constant dense<0.000000e+00> : vector<32x128xf32>
    %5 = tpu.matmul %3, %4, %cst {dimension_numbers = #tpu.dot_dimension_numbers<[1], [0], [0], [1], [0, 0, 1, 1], [], []>} : vector<32x8xf32>, vector<8x128xf32>, vector<32x128xf32> -> vector<32x128xf32>
    %c0_7 = arith.constant 0 : index
    %c0_8 = arith.constant 0 : index
    %6 = vector.load %arg6[%c0_7, %c0_8] : memref<32x8xf32, #tpu.memory_space<vmem>>, vector<32x8xf32>
    %c0_9 = arith.constant 0 : index
    %c0_10 = arith.constant 0 : index
    %7 = vector.load %arg4[%c0_9, %c0_10] : memref<8x128xf32, #tpu.memory_space<vmem>>, vector<8x128xf32>
    %cst_11 = arith.constant dense<0.000000e+00> : vector<32x128xf32>
    %8 = tpu.matmul %6, %7, %cst_11 {dimension_numbers = #tpu.dot_dimension_numbers<[1], [0], [0], [1], [0, 0, 1, 1], [], []>} : vector<32x8xf32>, vector<8x128xf32>, vector<32x128xf32> -> vector<32x128xf32>
    %9 = arith.addf %5, %8 : vector<32x128xf32>
    %c0_12 = arith.constant 0 : index
    %c0_13 = arith.constant 0 : index
    %10 = vector.load %arg7[%c0_12, %c0_13] : memref<32x1xf32, #tpu.memory_space<vmem>>, vector<32x1xf32>
    %11 = vector.broadcast %10 : vector<32x1xf32> to vector<32x128xf32>
    %12 = arith.addf %9, %11 : vector<32x128xf32>
    %cst_14 = arith.constant 0.000000e+00 : f32
    %13 = vector.broadcast %cst_14 : f32 to vector<32x128xf32>
    %14 = arith.maximumf %12, %13 : vector<32x128xf32>
    %c0_15 = arith.constant 0 : index
    %c0_16 = arith.constant 0 : index
    %15 = vector.load %arg9[%c0_15, %c0_16] : memref<16x1xf32, #tpu.memory_space<vmem>>, vector<16x1xf32>
    %c0_17 = arith.constant 0 : index
    %c0_18 = arith.constant 0 : index
    %16 = vector.load %arg8[%c0_17, %c0_18] : memref<16x32xf32, #tpu.memory_space<vmem>>, vector<16x32xf32>
    %cst_19 = arith.constant dense<0.000000e+00> : vector<16x128xf32>
    %17 = tpu.matmul %16, %14, %cst_19 {dimension_numbers = #tpu.dot_dimension_numbers<[1], [0], [0], [1], [0, 0, 1, 1], [], []>} : vector<16x32xf32>, vector<32x128xf32>, vector<16x128xf32> -> vector<16x128xf32>
    %18 = vector.broadcast %15 : vector<16x1xf32> to vector<16x128xf32>
    %19 = arith.addf %17, %18 : vector<16x128xf32>
    %cst_20 = arith.constant 0.000000e+00 : f32
    %20 = vector.broadcast %cst_20 : f32 to vector<16x128xf32>
    %21 = arith.maximumf %19, %20 : vector<16x128xf32>
    %c0_21 = arith.constant 0 : index
    %c0_22 = arith.constant 0 : index
    %22 = vector.load %arg11[%c0_21, %c0_22] : memref<8x1xf32, #tpu.memory_space<vmem>>, vector<8x1xf32>
    %c0_23 = arith.constant 0 : index
    %c0_24 = arith.constant 0 : index
    %23 = vector.load %arg10[%c0_23, %c0_24] : memref<8x16xf32, #tpu.memory_space<vmem>>, vector<8x16xf32>
    %cst_25 = arith.constant dense<0.000000e+00> : vector<8x128xf32>
    %24 = tpu.matmul %23, %21, %cst_25 {dimension_numbers = #tpu.dot_dimension_numbers<[1], [0], [0], [1], [0, 0, 1, 1], [], []>} : vector<8x16xf32>, vector<16x128xf32>, vector<8x128xf32> -> vector<8x128xf32>
    %25 = vector.broadcast %22 : vector<8x1xf32> to vector<8x128xf32>
    %26 = arith.addf %24, %25 : vector<8x128xf32>
    %cst_26 = arith.constant 0.000000e+00 : f32
    %27 = vector.broadcast %cst_26 : f32 to vector<8x128xf32>
    %28 = arith.maximumf %26, %27 : vector<8x128xf32>
    %c0_27 = arith.constant 0 : index
    %c0_28 = arith.constant 0 : index
    %29 = vector.load %arg12[%c0_27, %c0_28] : memref<8x1xf32, #tpu.memory_space<vmem>>, vector<8x1xf32>
    %30 = vector.broadcast %29 : vector<8x1xf32> to vector<8x128xf32>
    %31 = arith.mulf %30, %2 : vector<8x128xf32>
    %cst_29 = arith.constant dense<0.000000e+00> : vector<128xf32>
    %32 = vector.multi_reduction <add>, %31, %cst_29 [0] : vector<8x128xf32> to vector<128xf32>
    %33 = vector.shape_cast %32 : vector<128xf32> to vector<1x128xf32>
    %c0_30 = arith.constant 0 : index
    %c0_31 = arith.constant 0 : index
    %34 = vector.load %arg13[%c0_30, %c0_31] : memref<8x1xf32, #tpu.memory_space<vmem>>, vector<8x1xf32>
    %35 = vector.broadcast %34 : vector<8x1xf32> to vector<8x128xf32>
    %36 = arith.mulf %35, %28 : vector<8x128xf32>
    %cst_32 = arith.constant dense<0.000000e+00> : vector<128xf32>
    %37 = vector.multi_reduction <add>, %36, %cst_32 [0] : vector<8x128xf32> to vector<128xf32>
    %38 = vector.shape_cast %37 : vector<128xf32> to vector<1x128xf32>
    %39 = arith.addf %33, %38 : vector<1x128xf32>
    %c0_33 = arith.constant 0 : index
    %c0_34 = arith.constant 0 : index
    %40 = memref.load %arg14[%c0_33, %c0_34] : memref<1x1xf32, #tpu.memory_space<smem>>
    %41 = vector.broadcast %40 : f32 to vector<1x128xf32>
    %42 = arith.addf %39, %41 : vector<1x128xf32>
    %c0_35 = arith.constant 0 : index
    %c0_36 = arith.constant 0 : index
    %43 = vector.load %arg15[%c0_35, %c0_36] : memref<1x128xf32, #tpu.memory_space<vmem>>, vector<1x128xf32>
    tpu.vector_store %arg15[%c0_35, %c0_36], %42 {strides = array<i32>} : memref<1x128xf32, #tpu.memory_space<vmem>>, vector<1x128xf32>,
    return
  }
  func.func @transform_0(%arg0: i32) -> (i32, i32) {
    %c0_i32 = arith.constant 0 : i32
    %c0_i32_0 = arith.constant 0 : i32
    return %c0_i32, %arg0 : i32, i32
  }
  func.func @transform_1(%arg0: i32) -> (i32, i32) {
    %c0_i32 = arith.constant 0 : i32
    %c0_i32_0 = arith.constant 0 : i32
    return %c0_i32, %arg0 : i32, i32
  }
  func.func @transform_2(%arg0: i32) -> (i32, i32) {
    %c0_i32 = arith.constant 0 : i32
    %c0_i32_0 = arith.constant 0 : i32
    return %c0_i32, %arg0 : i32, i32
  }
  func.func @transform_3(%arg0: i32) -> (i32, i32) {
    %c0_i32 = arith.constant 0 : i32
    %c0_i32_0 = arith.constant 0 : i32
    return %c0_i32, %arg0 : i32, i32
  }
  func.func @transform_4(%arg0: i32) -> (i32, i32) {
    %c0_i32 = arith.constant 0 : i32
    %c0_i32_0 = arith.constant 0 : i32
    %c0_i32_1 = arith.constant 0 : i32
    return %c0_i32, %c0_i32_0 : i32, i32
  }
  func.func @transform_5(%arg0: i32) -> (i32, i32) {
    %c0_i32 = arith.constant 0 : i32
    %c0_i32_0 = arith.constant 0 : i32
    %c0_i32_1 = arith.constant 0 : i32
    return %c0_i32, %c0_i32_0 : i32, i32
  }
  func.func @transform_6(%arg0: i32) -> (i32, i32) {
    %c0_i32 = arith.constant 0 : i32
    %c0_i32_0 = arith.constant 0 : i32
    %c0_i32_1 = arith.constant 0 : i32
    return %c0_i32, %c0_i32_0 : i32, i32
  }
  func.func @transform_7(%arg0: i32) -> (i32, i32) {
    %c0_i32 = arith.constant 0 : i32
    %c0_i32_0 = arith.constant 0 : i32
    %c0_i32_1 = arith.constant 0 : i32
    return %c0_i32, %c0_i32_0 : i32, i32
  }
  func.func @transform_8(%arg0: i32) -> (i32, i32) {
    %c0_i32 = arith.constant 0 : i32
    %c0_i32_0 = arith.constant 0 : i32
    %c0_i32_1 = arith.constant 0 : i32
    return %c0_i32, %c0_i32_0 : i32, i32
  }
  func.func @transform_9(%arg0: i32) -> (i32, i32) {
    %c0_i32 = arith.constant 0 : i32
    %c0_i32_0 = arith.constant 0 : i32
    %c0_i32_1 = arith.constant 0 : i32
    return %c0_i32, %c0_i32_0 : i32, i32
  }
  func.func @transform_10(%arg0: i32) -> (i32, i32) {
    %c0_i32 = arith.constant 0 : i32
    %c0_i32_0 = arith.constant 0 : i32
    %c0_i32_1 = arith.constant 0 : i32
    return %c0_i32, %c0_i32_0 : i32, i32
  }
  func.func @transform_11(%arg0: i32) -> (i32, i32) {
    %c0_i32 = arith.constant 0 : i32
    %c0_i32_0 = arith.constant 0 : i32
    %c0_i32_1 = arith.constant 0 : i32
    return %c0_i32, %c0_i32_0 : i32, i32
  }
  func.func @transform_12(%arg0: i32) -> (i32, i32) {
    %c0_i32 = arith.constant 0 : i32
    %c0_i32_0 = arith.constant 0 : i32
    %c0_i32_1 = arith.constant 0 : i32
    return %c0_i32, %c0_i32_0 : i32, i32
  }
  func.func @transform_13(%arg0: i32) -> (i32, i32) {
    %c0_i32 = arith.constant 0 : i32
    %c0_i32_0 = arith.constant 0 : i32
    %c0_i32_1 = arith.constant 0 : i32
    return %c0_i32, %c0_i32_0 : i32, i32
  }
  func.func @transform_14(%arg0: i32) -> (i32, i32) {
    %c0_i32 = arith.constant 0 : i32
    %c0_i32_0 = arith.constant 0 : i32
    return %c0_i32, %arg0 : i32, i32
  }
}

</mosaic_0001>

<bundles_post_ra>
// kernel: neumf_forward.1
= control target key start
LH: loop header
LB: loop body
LE: loop exit
PB: predicated region body
PF: predicated region fallthrough
CT: control target
= control target key end

     0   :  { %vm61_vm0 = vcmask 64512   ;;  %v588_v3 = vmov 0   ;;  %vm302_vm1 = vcmask 261120   ;;  %v589_v40 = vmov 0.0|0.0   ;;  %s755_s3 = inlined_call_operand.vmem [shape: f32[8,128], index: 3, kind: input, shape index: {}]   ;;  %s756_s5 = inlined_call_operand.vmem [shape: f32[32,8], index: 5, kind: input, shape index: {}]   ;;  %s757_s2 = inlined_call_operand.vmem [shape: f32[8,128], index: 2, kind: input, shape index: {}]   ;;  %s758_s6 = inlined_call_operand.vmem [shape: f32[32,1], index: 6, kind: input, shape index: {}]   ;;  %s759_s4 = inlined_call_operand.vmem [shape: f32[32,8], index: 4, kind: input, shape index: {}]   ;;  %s760_s8 = inlined_call_operand.vmem [shape: f32[16,1], index: 8, kind: input, shape index: {}]   ;;  %s761_s10 = inlined_call_operand.vmem [shape: f32[8,1], index: 10, kind: input, shape index: {}]   ;;  %s762_s11 = inlined_call_operand.vmem [shape: f32[8,1], index: 11, kind: input, shape index: {}]   ;;  %s763_s12 = inlined_call_operand.vmem [shape: f32[8,1], index: 12, kind: input, shape index: {}]   ;;  %s764_s7 = inlined_call_operand.vmem [shape: f32[16,32], index: 7, kind: input, shape index: {}]   ;;  %s765_s9 = inlined_call_operand.vmem [shape: f32[8,16], index: 9, kind: input, shape index: {}]   ;;  %s766_s0 = inlined_call_operand.vmem [shape: f32[8,128], index: 0, kind: input, shape index: {}]   ;;  %s767_s1 = inlined_call_operand.vmem [shape: f32[8,128], index: 1, kind: input, shape index: {}]   ;;  %s768_s13 = inlined_call_operand.<no memory space> [shape: f32[1,1], index: 13, kind: input, shape index: {}]   ;;  %s769_s14 = inlined_call_operand.vmem [shape: f32[1,128], index: 14, kind: output, shape index: {}]  }
   0x1   :  { %v60_v0 = vld [vmem:[%s755_s3] sm:$0xff]  ;;  %v57_v2 = vld [vmem:[%s756_s5 + $0x8] sm:$0xff]  ;;  %586 = vset.pattern.permute.xlu0 %v588_v3  ;;  %587 = vset.pattern.permute.xlu1 %v588_v3  ;;  %v58_v5 = vld [vmem:[%s756_s5 + $0x10] sm:$0xff]  ;;  %vm590_vm2 = vmmov 0   ;;  %v591_v41 = vmov 0.0   ;;  %vm393_vm3 = vcmask 130048  }
   0x2   :  { %v56_v1 = vld [vmem:[%s756_s5] sm:$0xff]  ;;  %533 = vmatprep.subr.mxu0 %v60_v0  ;;  %v258_v7 = vld [vmem:[%s758_s6 + $0x10] sm:$0xff]  ;;  %v59_v8 = vld [vmem:[%s756_s5 + $0x18] sm:$0xff] }
   0x3   :  { %535 = vmatprep.mubr.msk.f32.mxu0 %vm61_vm0, %v56_v1  ;;  %v55_v4 = vld [vmem:[%s757_s2] sm:$0xff]  ;;  %534 = vmatpush3.msra.mxu0 %v60_v0  ;;  %v257_v10 = vld [vmem:[%s758_s6 + $0x8] sm:$0xff]  ;;  %v259_v11 = vld [vmem:[%s758_s6 + $0x18] sm:$0xff] }
   0x4   :  { %536 = vmatmul.mubr.msk.f32.vlgmr.msra.gmra.mrb[0].mxu0 %vm61_vm0, %v57_v2  ;;  %541 = vmatprep.subr.mxu0 %v55_v4  ;;  %v256_v6 = vld [vmem:[%s758_s6] sm:$0xff]  ;;  %v52_v12 = vld [vmem:[%s759_s4 + $0x8] sm:$0xff]  ;;  %v53_v13 = vld [vmem:[%s759_s4 + $0x10] sm:$0xff] }
   0x5   :  { %542 = vmatpush3.msra.mxu0 %v55_v4  ;;  %538 = vmatprep.mubr.msk.f32.mxu0 %vm61_vm0, %v58_v5  ;;  %v51_v9 = vld [vmem:[%s759_s4] sm:$0xff]  ;;  %v289_v15 = vld [vmem:[%s760_s8 + $0x8] sm:$0xff]  ;;  %v54_v16 = vld [vmem:[%s759_s4 + $0x18] sm:$0xff] }
   0x6   :  { %262 = vperm.xlu0 %586, %v256_v6   ;;  %272 = vperm.xlu1 %587, %v258_v7   ;;  %v288_v14 = vld [vmem:[%s760_s8] sm:$0xff]  ;;  %v291_v39 = vld [vmem:[%s764_s7 + $0x8] sm:$0xff] }
   0x7   :  { %v386_v17 = vld [vmem:[%s761_s10] sm:$0xff] }
   0x8   :  { %539 = vmatmul.mubr.msk.f32.gmra.mrb[2].mxu0 %vm61_vm0, %v59_v8  ;;  %v468_v18 = vld [vmem:[%s762_s11] sm:$0xff] }
   0x9   :  { %543 = vmatprep.mubr.msk.f32.mxu0 %vm61_vm0, %v51_v9  ;;  %v481_v19 = vld [vmem:[%s763_s12] sm:$0xff] }
   0xa   :  { %267 = vperm.xlu0 %586, %v257_v10   ;;  %277 = vperm.xlu1 %587, %v259_v11   ;;  %v290_v20 = vld [vmem:[%s764_s7] sm:$0xff] }
   0xb   :  { %557 = vmatprep.mubr.msk.f32.mxu1 %vm302_vm1, %v290_v20  ;;  %v387_v51 = vld [vmem:[%s765_s9] sm:$0xff] }
   0xc   :  { %544 = vmatmul.mubr.msk.f32.vlgmr.msra.gmra.mrb[0].mxu0 %vm61_vm0, %v52_v12  ;;  %v48_v52 = vld [vmem:[%s766_s0] sm:$0xff]  ;;  %v496_v12 = vstv %s768_s13 }
   0xd   :  { %546 = vmatprep.mubr.msk.f32.mxu0 %vm61_vm0, %v53_v13  ;;  %v49_v53 = vld [vmem:[%s767_s1] sm:$0xff] }
   0xe   :  { %294 = vperm.xlu0 %586, %v288_v14   ;;  %299 = vperm.xlu1 %587, %v289_v15   ;;  %v50_v54 = vmul.f32 %v49_v53, %v48_v52 }
  0x10   :  { %547 = vmatmul.mubr.msk.f32.gmra.mrb[2].mxu0 %vm61_vm0, %v54_v16 }
  0x12   :  { %390 = vperm.xlu0 %586, %v386_v17   ;;  %471 = vperm.xlu1 %587, %v468_v18  }
  0x16   :  { %484 = vperm.xlu0 %586, %v481_v19  }
  0x85   :  { %v263_v21 = vpop.permute.xlu0 %262  ;;  %v273_v22 = vpop.permute.xlu1 %272 }
  0x89   :  { %v268_v23 = vpop.permute.xlu0 %267  ;;  %v278_v29 = vpop.permute.xlu1 %277 }
  0x8d   :  { %v300_v42 = vpop.permute.xlu1 %299  ;;  %v295_v44 = vpop.permute.xlu0 %294 }
  0x91   :  { %v472_v55 = vpop.permute.xlu1 %471  ;;  %v391_v58 = vpop.permute.xlu0 %390 }
  0x92   :  { %v474_v56 = vmul.f32 %v472_v55, %v50_v54 }
  0x94   :  { %v475_v57 = vrot.slane %v474_v56, 4 }
  0x95   :  { %v485_v0 = vpop.permute.xlu0 %484 }
  0x96   :  { %v476_v60 = vadd.f32 %v475_v57, %v474_v56 }
  0x98   :  { %v477_v1 = vrot.slane %v476_v60, 2 }
  0x9a   :  { %v478_v4 = vadd.f32 %v477_v1, %v476_v60 }
  0x9c   :  { %v479_v7 = vrot.slane %v478_v4, 1 }
  0x9e   :  { %v480_v10 = vadd.f32 %v479_v7, %v478_v4 }
  0xdf   :  { %v545_v24 = vpop.f32.mrb[0].mxu0 }
  0xe0   :  { %v281_v25 = vadd.f32 %v545_v24, %v268_v23  ;;  %v237_v26 = vpop.f32.mrb[1].mxu0 }
  0xe1   :  { %v280_v27 = vadd.f32 %v263_v21, %v237_v26 }
  0xe2   :  { %v285_v28 = vmax.f32 %v281_v25, 0.0 }
  0xe3   :  { %v284_v30 = vmax.f32 %v280_v27, 0.0  ;;  %v548_v31 = vpop.f32.mrb[2].mxu0 }
  0xe4   :  { %v283_v32 = vadd.f32 %v548_v31, %v278_v29  ;;  %v247_v33 = vpop.f32.mrb[3].mxu0 }
  0xe5   :  { %v282_v34 = vadd.f32 %v273_v22, %v247_v33  ;;  %v567_v35 = vpack.c.bf16 %v285_v28, %v284_v30 }
  0xe6   :  { %v287_v36 = vmax.f32 %v283_v32, 0.0 }
  0xe7   :  { %v286_v37 = vmax.f32 %v282_v34, 0.0  ;;  %568 = vmatprep.subr.bf16.mxu1 %v567_v35 }
  0xe8   :  { %570 = vmatpush3.bf16.msra.mxu1 %v567_v35 }
  0xe9   :  { %v571_v38 = vpack.c.bf16 %v287_v36, %v286_v37 }
  0xeb   :  { %572 = vmatprep.subr.bf16.mxu1 %v571_v38 }
  0xec   :  { %574 = vmatpush3.bf16.msra.mxu1 %v571_v38 }
  0xed   :  { %575 = vmatprep.subr.bf16.mxu1 %v589_v40 }
  0xef   :  { %558 = vmatmul.mubr.msk.f32.vlgmr.msra.gmra.mrb[0].mxu1 %vm302_vm1, %v291_v39 }
  0xf0   :  { %564 = vmatprep.mubr.msk.f32.mxu1 %vm590_vm2, %v591_v41 }
 0x1c2   :  { %v559_v43 = vpop.f32.mrb[0].mxu1 }
 0x1c3   :  { %v381_v45 = vadd.f32 %v559_v43, %v300_v42  ;;  %v375_v46 = vpop.f32.mrb[1].mxu1 }
 0x1c4   :  { %v376_v47 = vadd.f32 %v375_v46, %v295_v44 }
 0x1c5   :  { %v385_v48 = vmax.f32 %v381_v45, 0.0 }
 0x1c6   :  { %v384_v49 = vmax.f32 %v376_v47, 0.0 }
 0x1c8   :  { %v576_v50 = vpack.c.bf16 %v385_v48, %v384_v49 }
 0x1ca   :  { %577 = vmatpush3.bf16.msra.mxu1 %v576_v50 }
 0x1cd   :  { %565 = vmatmul.mubr.msk.f32.vlgmr.msra.gmra.mrb[2].mxu1 %vm393_vm3, %v387_v51 }
 0x2a0   :  { %v463_v59 = vpop.f32.mrb[2].mxu1 }
 0x2a1   :  { %v464_v61 = vadd.f32 %v463_v59, %v391_v58  ;;  %v566_v62 = vpop.f32.mrb[3].mxu1 }
 0x2a3   :  { %v467_v63 = vmax.f32 %v464_v61, 0.0 }
 0x2a5   :  { %v487_v2 = vmul.f32 %v485_v0, %v467_v63 }
 0x2a7   :  { %v488_v3 = vrot.slane %v487_v2, 4 }
 0x2a9   :  { %v489_v5 = vadd.f32 %v488_v3, %v487_v2 }
 0x2ab   :  { %v490_v6 = vrot.slane %v489_v5, 2 }
 0x2ad   :  { %v491_v8 = vadd.f32 %v490_v6, %v489_v5 }
 0x2af   :  { %v492_v9 = vrot.slane %v491_v8, 1 }
 0x2b1   :  { %v493_v11 = vadd.f32 %v492_v9, %v491_v8 }
 0x2b3   :  { %v494_v13 = vadd.f32 %v493_v11, %v480_v10 }
 0x2b5   :  { %v497_v14 = vadd.f32 %v496_v12, %v494_v13 }
 0x2b7   :  { %498 = vst [vmem:[%s769_s14] sm:$0x1] %v497_v14 }

</bundles_post_ra>
